<compile_context>
chip_gen: v6e
topology: v6e:2x2x1
jax: 0.10.0
libtpu: 0.0.40
codegen_flags: <defaults>
</compile_context>

<pallas_src>
import functools

import jax
import jax.numpy as jnp
from jax.experimental import pallas as pl
from jax.experimental.pallas import tpu as pltpu


# --------------------------------------------------------------------------- #
# helpers
# --------------------------------------------------------------------------- #
def _round_up(v, m):
    return (v + m - 1) // m * m


def _pick_tile(dim, target, align, min_tile=None):
    """Tile size (multiple of `align`, <= target) minimizing padding of `dim`.

    Ties are broken toward the larger tile. If `dim` (rounded to `align`)
    already fits under `target`, the whole dimension becomes one tile.
    """
    align = max(1, align)
    target = max(align, (target // align) * align)
    dim_al = _round_up(dim, align)
    if dim_al <= target:
        return dim_al
    lo = max(align, min_tile or align)
    best_t, best_pad = target, _round_up(dim, target)
    t = target - align
    while t >= lo:
        pad = _round_up(dim, t)
        if pad < best_pad:
            best_t, best_pad = t, pad
        t -= align
    return best_t


@functools.lru_cache(maxsize=1)
def _tpu_config():
    """Generation-aware tile targets and VMEM cap."""
    try:
        info = pltpu.get_tpu_info()
        cap = int(getattr(info, "vmem_capacity_bytes", 64 << 20))
    except Exception:
        cap = 64 << 20  # conservative: v7x per-TC VMEM
    if cap >= (128 << 20):  # v5e / v6e: 128 MiB physical VMEM
        return dict(vmem_cap=100 << 20, tm_target=512, tn_target=512,
                    tk_full_max=4096, tk_target=2048)
    # v7x-class parts: 64 MiB per TensorCore -> leave headroom for Mosaic scratch
    return dict(vmem_cap=min(48 << 20, (cap * 3) // 4),
                tm_target=256, tn_target=512,
                tk_full_max=2048, tk_target=1024)


# --------------------------------------------------------------------------- #
# kernels
# --------------------------------------------------------------------------- #
def _matmul_kernel_noacc(x_ref, w_ref, o_ref):
    """Full-K contraction for one (tm, tn) output tile. No reduction axis."""
    o_ref[...] = jnp.dot(
        x_ref[...], w_ref[...], preferred_element_type=jnp.float32
    ).astype(o_ref.dtype)


def _matmul_kernel_acc_inplace(x_ref, w_ref, o_ref):
    """K-tiled contraction, f32 output: accumulate directly into the
    VMEM-resident output tile (no scratch, no epilogue copy)."""
    @pl.when(pl.program_id(2) == 0)
    def _():
        o_ref[...] = jnp.zeros_like(o_ref)

    o_ref[...] += jnp.dot(
        x_ref[...], w_ref[...], preferred_element_type=jnp.float32
    )


def _matmul_kernel_acc_scratch(x_ref, w_ref, o_ref, acc_ref):
    """K-tiled contraction with f32 scratch accumulator (non-f32 outputs)."""
    k = pl.program_id(2)

    @pl.when(k == 0)
    def _():
        acc_ref[...] = jnp.zeros_like(acc_ref)

    acc_ref[...] += jnp.dot(
        x_ref[...], w_ref[...], preferred_element_type=jnp.float32
    )

    @pl.when(k == pl.num_programs(2) - 1)
    def _():
        o_ref[...] = acc_ref[...].astype(o_ref.dtype)


# --------------------------------------------------------------------------- #
# wrapper
# --------------------------------------------------------------------------- #
class ColumnParallelLinearPallas:
    """y = x @ weight.T (F.linear, bias=None), world_size == 1.

    The weight is transposed to [K, N] and zero-padded to tile multiples ONCE
    at construction (zero K/N padding contributes nothing to the contraction),
    so the per-call path only pads x and launches the kernel.
    """

    def __init__(self, weight, *, compute_dtype=None,
                 tm_target=None, tn_target=None,
                 tk_full_max=None, tk_target=None):
        N, K = weight.shape
        cfg = dict(_tpu_config())
        if tm_target is not None:
            cfg["tm_target"] = tm_target
        if tn_target is not None:
            cfg["tn_target"] = tn_target
        if tk_full_max is not None:
            cfg["tk_full_max"] = tk_full_max
        if tk_target is not None:
            cfg["tk_target"] = tk_target

        self.N, self.K = N, K
        self.cfg = cfg
        self.compute_dtype = compute_dtype

        # ---- static tile selection (depends only on K, N, generation) -----
        n_al = _round_up(N, 128)
        tn_tgt = cfg["tn_target"]
        if n_al >= 256:
            # Guarantee >= 2 column blocks so the grid never degenerates to
            # (1, 1) for decode-sized M (keeps both v7x TensorCores busy).
            tn_tgt = min(tn_tgt, max(128, ((n_al // 2) // 128) * 128))
        self.tn = _pick_tile(N, tn_tgt, 128)

        k_al = _round_up(K, 128)
        if k_al <= cfg["tk_full_max"]:
            # Contract full K in one shot: no reduction axis, single wide
            # lane-dense store per output tile.
            self.tk = k_al
            self.use_acc = False
        else:
            # Large K: keep tk big (>= tk_target/2) to limit accumulator
            # read-modify-write traffic and per-step grid overhead.
            self.tk = _pick_tile(K, cfg["tk_target"], 128,
                                 min_tile=max(128, cfg["tk_target"] // 2))
            self.use_acc = True

        self.Np = _round_up(N, self.tn)
        self.Kp = _round_up(K, self.tk)

        # ---- one-time weight layout: [N, K] -> padded [Kp, Np] ------------
        w_t = weight.T  # MXU-native RHS: K contracts, N on the lane axis.
        if (self.Kp, self.Np) != (K, N):
            w_t = jnp.pad(w_t, ((0, self.Kp - K), (0, self.Np - N)))
        if compute_dtype is not None:
            w_t = w_t.astype(compute_dtype)
        self.w_t = w_t

    def __call__(self, x):
        N, K, Kp, Np = self.N, self.K, self.Kp, self.Np
        tn, tk, use_acc, cfg = self.tn, self.tk, self.use_acc, self.cfg

        *lead, Kx = x.shape
        assert Kx == K, "in_features mismatch"
        M = 1
        for d in lead:
            M *= d
        out_dtype = x.dtype

        x2d = x.reshape(M, K)
        if self.compute_dtype is not None:
            x2d = x2d.astype(self.compute_dtype)

        x_isz = jnp.dtype(x2d.dtype).itemsize
        w_isz = jnp.dtype(self.w_t.dtype).itemsize
        o_isz = jnp.dtype(out_dtype).itemsize
        sub_align = max(8, 32 // x_isz)

        tm = _pick_tile(M, cfg["tm_target"], sub_align)
        Mp = _round_up(M, tm)
        if (Mp, Kp) != (M, K):
            x2d = jnp.pad(x2d, ((0, Mp - M), (0, Kp - K)))

        # ---- VMEM budget: double-buffered x/w tiles + output + scratch ----
        acc_bytes = tm * tn * 4 if (use_acc and out_dtype != jnp.float32) else 0
        vmem_bytes = (2 * (tm * tk * x_isz + tk * tn * w_isz)
                      + 2 * tm * tn * o_isz + acc_bytes)
        vmem_limit = int(min(max(vmem_bytes + (8 << 20), 32 << 20),
                             cfg["vmem_cap"]))

        # Weight is re-streamed once per row tile of x.
        cost = pl.CostEstimate(
            flops=2 * M * N * K,
            transcendentals=0,
            bytes_accessed=(x_isz * M * K
                            + w_isz * (Mp // tm) * K * N
                            + o_isz * M * N),
        )

        if not use_acc:
            grid = (Mp // tm, Np // tn)
            grid_spec = pltpu.PrefetchScalarGridSpec(
                num_scalar_prefetch=0,
                grid=grid,
                in_specs=[
                    pl.BlockSpec((tm, Kp), lambda i, j: (i, 0)),   # x tile
                    pl.BlockSpec((Kp, tn), lambda i, j: (0, j)),   # wT tile
                ],
                out_specs=pl.BlockSpec((tm, tn), lambda i, j: (i, j)),
            )
            kernel = _matmul_kernel_noacc
            dims = ("parallel", "parallel")
        else:
            grid = (Mp // tm, Np // tn, Kp // tk)
            in_specs = [
                pl.BlockSpec((tm, tk), lambda i, j, k: (i, k)),    # x tile
                pl.BlockSpec((tk, tn), lambda i, j, k: (k, j)),    # wT tile
            ]
            out_spec = pl.BlockSpec((tm, tn), lambda i, j, k: (i, j))
            if out_dtype == jnp.float32:
                grid_spec = pltpu.PrefetchScalarGridSpec(
                    num_scalar_prefetch=0, grid=grid,
                    in_specs=in_specs, out_specs=out_spec,
                )
                kernel = _matmul_kernel_acc_inplace
            else:
                grid_spec = pltpu.PrefetchScalarGridSpec(
                    num_scalar_prefetch=0, grid=grid,
                    in_specs=in_specs, out_specs=out_spec,
                    scratch_shapes=[pltpu.VMEM((tm, tn), jnp.float32)],
                )
                kernel = _matmul_kernel_acc_scratch
            dims = ("parallel", "parallel", "arbitrary")

        out2d = pl.pallas_call(
            kernel,
            out_shape=jax.ShapeDtypeStruct((Mp, Np), out_dtype),
            grid_spec=grid_spec,
            compiler_params=pltpu.CompilerParams(
                dimension_semantics=dims,
                vmem_limit_bytes=vmem_limit,
            ),
            cost_estimate=cost,
        )(x2d, self.w_t)

        return out2d[:M, :N].reshape(*lead, N)


def column_parallel_linear(x, weight, **kwargs):
    """One-shot convenience wrapper. For repeated calls construct
    ColumnParallelLinearPallas once so the weight transpose/pad is cached."""
    return ColumnParallelLinearPallas(weight, **kwargs)(x)


# --------------------------------------------------------------------------- #
# self-test
# --------------------------------------------------------------------------- #
if __name__ == "__main__":
    key = jax.random.PRNGKey(0)
    kx, kw, kx2, kw2 = jax.random.split(key, 4)

    # ColumnParallelLinear(in_features=128, out_features=256, bias=False),
    # world_size=1 -> part_out_features=256, no bias.  Full-K fast path.
    batch, seq = 2, 8
    in_features, out_features = 128, 256
    x = jax.random.normal(kx, (batch, seq, in_features), dtype=jnp.float32)
    weight = jax.random.normal(
        kw, (out_features, in_features), dtype=jnp.float32) * 0.02

    layer = ColumnParallelLinearPallas(weight)   # weight prep happens once here
    y = jax.block_until_ready(layer(x))
    y_ref = jnp.einsum("bsk,nk->bsn", x, weight)
    assert y.shape == (batch, seq, out_features)
    assert jnp.allclose(y, y_ref, atol=1e-3, rtol=1e-3)

    # Non-aligned shapes; force the K-tiled accumulate-into-output path with a
    # small tk_full_max so it is exercised at small test sizes on every chip.
    b2, s2, k2, n2 = 3, 5, 300, 200
    x2 = jax.random.normal(kx2, (b2, s2, k2), dtype=jnp.float32)
    w2 = jax.random.normal(kw2, (n2, k2), dtype=jnp.float32) * 0.02
    layer2 = ColumnParallelLinearPallas(w2, tk_full_max=128, tk_target=128)
    y2 = jax.block_until_ready(layer2(x2))
    y2_ref = jnp.einsum("bsk,nk->bsn", x2, w2)
    assert y2.shape == (b2, s2, n2)
    assert jnp.allclose(y2, y2_ref, atol=1e-3, rtol=1e-3)

    # Functional convenience wrapper (same semantics).
    y3 = jax.block_until_ready(column_parallel_linear(x, weight))
    assert jnp.allclose(y3, y_ref, atol=1e-3, rtol=1e-3)

    print("KERNEL_OK")
</pallas_src>

<mosaic_0001>
module attributes {stable_mosaic.version = 11 : i64} {
  func.func @_matmul_kernel_noacc(%arg0: i32, %arg1: i32, %arg2: memref<16x128xf32, #tpu.memory_space<vmem>>, %arg3: memref<128x128xf32, #tpu.memory_space<vmem>>, %arg4: memref<16x128xf32, #tpu.memory_space<vmem>>) attributes {dimension_semantics = [#tpu.dimension_semantics<parallel>, #tpu.dimension_semantics<parallel>], iteration_bounds = array<i64: 1, 2>, scalar_prefetch = 0 : i64, scratch_operands = 0 : i64, tpu.core_type = #tpu.core_type<tc>, window_params = [{transform_indices = @transform_0, window_bounds = array<i64: 16, 128>}, {transform_indices = @transform_1, window_bounds = array<i64: 128, 128>}, {transform_indices = @transform_2, window_bounds = array<i64: 16, 128>}]} {
    %c0 = arith.constant 0 : index
    %c0_0 = arith.constant 0 : index
    %0 = vector.load %arg2[%c0, %c0_0] : memref<16x128xf32, #tpu.memory_space<vmem>>, vector<16x128xf32>
    %c0_1 = arith.constant 0 : index
    %c0_2 = arith.constant 0 : index
    %1 = vector.load %arg3[%c0_1, %c0_2] : memref<128x128xf32, #tpu.memory_space<vmem>>, vector<128x128xf32>
    %cst = arith.constant dense<0.000000e+00> : vector<16x128xf32>
    %2 = tpu.matmul %0, %1, %cst {dimension_numbers = #tpu.dot_dimension_numbers<[1], [0], [0], [1], [0, 0, 1, 1], [], []>} : vector<16x128xf32>, vector<128x128xf32>, vector<16x128xf32> -> vector<16x128xf32>
    %c0_3 = arith.constant 0 : index
    %c0_4 = arith.constant 0 : index
    %3 = vector.load %arg4[%c0_3, %c0_4] : memref<16x128xf32, #tpu.memory_space<vmem>>, vector<16x128xf32>
    tpu.vector_store %arg4[%c0_3, %c0_4], %2 {strides = array<i32>} : memref<16x128xf32, #tpu.memory_space<vmem>>, vector<16x128xf32>,
    return
  }
  func.func @transform_0(%arg0: i32, %arg1: i32) -> (i32, i32) {
    %c0_i32 = arith.constant 0 : i32
    %c0_i32_0 = arith.constant 0 : i32
    return %arg0, %c0_i32 : i32, i32
  }
  func.func @transform_1(%arg0: i32, %arg1: i32) -> (i32, i32) {
    %c0_i32 = arith.constant 0 : i32
    %c0_i32_0 = arith.constant 0 : i32
    return %c0_i32, %arg1 : i32, i32
  }
  func.func @transform_2(%arg0: i32, %arg1: i32) -> (i32, i32) {
    %c0_i32 = arith.constant 0 : i32
    return %arg0, %arg1 : i32, i32
  }
}

</mosaic_0001>

<bundles_post_ra>
// kernel: tpu_custom_call.1
= control target key start
LH: loop header
LB: loop body
LE: loop exit
PB: predicated region body
PF: predicated region fallthrough
CT: control target
= control target key end

     0   :  { %7 = vsyncpa [#allocation3], 0  ;;  %s918_s0 = inlined_call_operand.hbm [shape: f32[16,128], index: 0, kind: input, shape index: {}]   ;;  %s919_s1 = inlined_call_operand.hbm [shape: f32[128,256], index: 1, kind: input, shape index: {}]   ;;  %s920_s2 = inlined_call_operand.hbm [shape: f32[16,256], index: 2, kind: output, shape index: {}]  }
   0x1   :  { %8 = vsyncpa [#allocation6], 0 }
   0x2   :  { %10 = vsyncpa [#allocation6 + $0x1], 0 }
   0x3   :  { %11 = vsyncpa [#allocation4], 0 }
   0x4   :  { %13 = vsyncpa [#allocation4 + $0x1], 0  ;;  %s719_s9 = smov 0   ;;  %s721_s10 = smov 0  }
   0x5   :  { %s723_s11 = smov 0   ;;  %s725_s12 = smov 0  }
   0x6   :  { %s727_s13 = smov 0   ;;  %s729_s14 = smov 0  }
   0x7 LB: > { %926 = sst [smem:[#allocation11_spill]] %s693_s14  ;;  %s408_s15 = sadd.s32 4294967295, %s693_s14   ;;  %s693_s14 = sphi %s729_s14, %s946_s14   ;;  %s689_s13 = sphi %s727_s13, %s945_s13   ;;  %s685_s12 = sphi %s725_s12, %s944_s12   ;;  %s681_s11 = sphi %s723_s11, %s943_s11   ;;  %s677_s10 = sphi %s721_s10, %s942_s10   ;;  %s673_s9 = sphi %s719_s9, %s941_s9  }
   0x8   : > { %s409_s16 = sadd.s32 4294967294, %s693_s14   ;;  %p71_p0 = scmp.ne.s32.totalorder %s681_s11, %s677_s10 }
   0x9   : > { %p72_p1 = scmp.eq.s32.totalorder %s693_s14, 0  ;;  %p77_p2 = scmp.ne.s32.totalorder %s677_s10, %s673_s9 }
   0xa   : > { %p756_p3 = scmp.eq.s32.totalorder %s408_s15, 0  ;;  %p103_p5 = scmp.eq.s32.totalorder %s408_s15, 1 }
   0xb   : > { %p760_p4 = por %p72_p1, %p71_p0  ;;  %p109_p7 = scmp.eq.s32.totalorder %s409_s16, 1 }
   0xc   : > { %p766_p6 = por %p756_p3, %p77_p2  ;;  %p770_p8 = por %p103_p5, %p71_p0 }
   0xd   : > { %p410_p9 = scmp.ge.s32.totalorder %s693_s14, 1  ;;  %p775_p10 = por %p109_p7, %p77_p2 }
   0xe   : > { %s929_s19 = scalar_select %p766_p6, 1, 0 }
   0xf   : > { %s930_s20 = scalar_select %p770_p8, 1, 0 }
  0x10   : > { %s931_s21 = scalar_select %p775_p10, 1, 0 }
  0x11   : > { %p116_p11 = scmp.lt.s32.totalorder %s693_s14, 3  ;;  %s695_s23 = smov [#allocation2]  }
  0x12   : > { %s131_s24 = sshll.u32 %s695_s23, 4  ;;  %p497_p1 = scmp.lt.s32.totalorder %s693_s14, 2  ;;  %s132_s24 = int_to_ptr.vmem [resolvable:$true] %s131_s24 }
  0x13   : > { %p780_p12 = pnand %p410_p9, %p116_p11  ;;  %s28_s27 = sadd.s32 1, %s689_s13 }
  0x14   : > { %p796_p2 = pnand %p497_p1, %p760_p4  ;;  %s566_s28 = scalar_lea.vmem %s132_s24, 256 }
  0x15   : > { %p484_p13 = pneg %p780_p12  ;;  %p567_p9 = scmp.ne.s32.totalorder %s132_s24, %s566_s28 }
  0x16   : > { %p574_p0 = scmp.lt.s32.totalorder %s132_s24, %s132_s24  ;;  %p575_p8 = scmp.lt.s32.totalorder %s566_s28, %s566_s28 }
  0x17   : > { %p790_p5 = pnand %p484_p13, %p756_p3 }
  0x18   : > { %p576_p6 = por %p575_p8, %p574_p0 }
  0x19   : > { %p557_p7 = pneg %p790_p5 }
  0x1b   : > { %p569_p11 = pnand %p567_p9, %p557_p7 }
  0x1d   : > { %p570_p10 = pneg %p569_p11 }
  0x1f   : > { %p577_p13 = pnand %p576_p6, %p570_p10 }
  0x21   : > { %580 = shalt.err (!%p577_p13)
}
  0x22   : > { %s925_s29 = smov 128   ;;  %s697_s30 = smov 8  }
  0x23   : > { %487 = dma.hbm_to_vmem [thread:$0]  (!%p790_p5), %s918_s0, 256, %s132_s24, [#allocation3], %s925_s29, %s925_s29, %s697_s30  }
  0x24   : > { %p29_p4 = scmp.ge.s32.totalorder %s28_s27, 2  ;;  %s64_s5 = sadd.s32 1, %s681_s11 }
  0x25   : > { %s145_s6 = sand.u32 1, %s681_s11   ;;  %s414_s15 = sshll.u32 %s689_s13, 7 }
  0x26   : > { %s948_s27 = smov (%p29_p4, %s28_s27), 0  ;;  %s413_s7 = sshll.u32 %s145_s6, 7 }
  0x27   : > { %s61_s8 = ssub.s32 %s689_s13, %s948_s27  ;;  %s154_s23 = scalar_lea.hbm %s919_s1, %s414_s15 }
  0x28   : > { %p62_p6 = scmp.eq.s32.totalorder %s61_s8, 0  ;;  %s149_s25 = scalar_lea.vmem [#allocation5], %s413_s7 }
  0x29   : > { %s155_s28 = sshll.u32 %s149_s25, 4  ;;  %s146_s24 = scalar_lea.sflag [#allocation6], %s145_s6  ;;  %s156_s28 = int_to_ptr.vmem [resolvable:$true] %s155_s28 }
  0x2a   : > { %s822_s14 = scalar_select %p62_p6, %s681_s11, %s64_s5  }
  0x2b   : > { %p583_p8 = pneg %p796_p2  ;;  %s594_s3 = scalar_lea.vmem %s156_s28, 2048 }
  0x2c   : > { %p595_p10 = scmp.ne.s32.totalorder %s156_s28, %s594_s3  ;;  %s698_s4 = smov [#allocation5]  }
  0x2d   : > { %s599_s29 = sshll.u32 %s698_s4, 4  ;;  %s600_s29 = int_to_ptr.vmem [resolvable:$false] %s599_s29 }
  0x2e   : > { %p597_p0 = pnand %p595_p10, %p583_p8  ;;  %s601_s8 = scalar_lea.vmem %s600_s29, 4096 }
  0x2f   : > { %p602_p5 = scmp.lt.s32.totalorder %s156_s28, %s600_s29  ;;  %p603_p7 = scmp.lt.s32.totalorder %s601_s8, %s594_s3 }
  0x30   : > { %p598_p1 = pneg %p597_p0 }
  0x31   : > { %p604_p9 = por %p603_p7, %p602_p5 }
  0x33   : > { %p605_p11 = pnand %p604_p9, %p598_p1 }
  0x35   : > { %608 = shalt.err (!%p605_p11)
}
  0x36   : > { %s699_s7 = smov 256   ;;  %s935_s5 = smov 128  }
  0x37   : > { %491 = dma.hbm_to_vmem [thread:$0]  (!%p796_p2), %s154_s23, 2048, %s156_s28, %s146_s24, %s699_s7, %s935_s5, %s697_s30  }
  0x38   : > { %167 = sbr.rel (%p780_p12) target bundleno = 309 (0x135), region = 28 }
  0x3d   : > { %660 = dma.done.wait (%p756_p3), [#allocation3], 256  }
  0x3e   : > { %662 = vsyncadd (%p756_p3), [#allocation3], 4294967040  ;;  %s837_s29 = sand.u32 1, %s677_s10   ;;  %p936_p2 = scmp.ne.s32.totalorder %s929_s19, 0 }
  0x3f   : > { %s417_s6 = sshll.u32 %s837_s29, 7  ;;  %s174_s26 = scalar_lea.sflag [#allocation6], %s837_s29 }
  0x40   : > { %s841_s15 = scalar_lea.vmem [#allocation5], %s417_s6 }
  0x41   : > { %664 = dma.done.wait (%p936_p2), %s174_s26, 2048  }
  0x42   : > { %666 = vsyncadd (%p936_p2), %s174_s26, 4294965248  ;;  %v217_v0 = vld [vmem:[%s841_s15 + $0x78] sm:$0xff]  ;;  %v216_v1 = vld [vmem:[%s841_s15 + $0x70] sm:$0xff]  ;;  %s418_s17 = sshll.u32 %s837_s29, 4  ;;  %s420_s30 = sshll.u32 %s685_s12, 7 }
  0x43   : > { %441 = vmatprep.subr.mxu0 %v217_v0  ;;  %v215_v2 = vld [vmem:[%s841_s15 + $0x68] sm:$0xff]  ;;  %v214_v3 = vld [vmem:[%s841_s15 + $0x60] sm:$0xff]  ;;  %v200_v4 = vld [vmem:[#allocation2] sm:$0xff]  ;;  %s197_s19 = scalar_lea.vmem [#allocation7], %s418_s17  ;;  %s870_s23 = scalar_lea.hbm %s920_s2, %s420_s30 }
  0x44   : > { %442 = vmatpush3.msra.mxu0 %v217_v0  ;;  %v213_v5 = vld [vmem:[%s841_s15 + $0x58] sm:$0xff]  ;;  %473 = vmatprep.mubr.f32.mxu0 %v200_v4  ;;  %v212_v6 = vld [vmem:[%s841_s15 + $0x50] sm:$0xff]  ;;  %v211_v7 = vld [vmem:[%s841_s15 + $0x48] sm:$0xff]  ;;  %s311_s22 = sshll.u32 %s197_s19, 4  ;;  %s296_s25 = scalar_lea.sflag [#allocation4], %s837_s29  ;;  %s865_s22 = int_to_ptr.vmem [resolvable:$true] %s311_s22 }
  0x45   : > { %443 = vmatprep.subr.mxu0 %v216_v1  ;;  %v210_v8 = vld [vmem:[%s841_s15 + $0x40] sm:$0xff]  ;;  %v209_v9 = vld [vmem:[%s841_s15 + $0x38] sm:$0xff]  ;;  %v208_v10 = vld [vmem:[%s841_s15 + $0x30] sm:$0xff]  ;;  %s609_s28 = scalar_lea.vmem %s865_s22, 256  ;;  %p937_p12 = scmp.ne.s32.totalorder %s930_s20, 0 }
  0x46   : > { %444 = vmatpush3.msra.mxu0 %v216_v1  ;;  %v207_v11 = vld [vmem:[%s841_s15 + $0x28] sm:$0xff]  ;;  %v206_v12 = vld [vmem:[%s841_s15 + $0x20] sm:$0xff]  ;;  %v205_v13 = vld [vmem:[%s841_s15 + $0x18] sm:$0xff]  ;;  %p610_p3 = scmp.ne.s32.totalorder %s865_s22, %s609_s28  ;;  %s700_s12 = smov [#allocation7]  }
  0x47   : > { %445 = vmatprep.subr.mxu0 %v215_v2  ;;  %v204_v14 = vld [vmem:[%s841_s15 + $0x10] sm:$0xff]  ;;  %v203_v15 = vld [vmem:[%s841_s15 + $0x8] sm:$0xff]  ;;  %v202_v16 = vld [vmem:[%s841_s15] sm:$0xff]  ;;  %s613_s24 = sshll.u32 %s700_s12, 4  ;;  %s614_s24 = int_to_ptr.vmem [resolvable:$false] %s613_s24 }
  0x48   : > { %446 = vmatpush3.msra.mxu0 %v215_v2  ;;  %v201_v17 = vld [vmem:[#allocation2 + $0x8] sm:$0xff]  ;;  %p611_p13 = pnand %p610_p3, %p937_p12  ;;  %s615_s3 = scalar_lea.vmem %s614_s24, 512 }
  0x49   : > { %447 = vmatprep.subr.mxu0 %v214_v3  ;;  %p616_p6 = scmp.lt.s32.totalorder %s865_s22, %s614_s24  ;;  %p617_p8 = scmp.lt.s32.totalorder %s615_s3, %s609_s28 }
  0x4a   : > { %448 = vmatpush3.msra.mxu0 %v214_v3  ;;  %p612_p4 = pneg %p611_p13 }
  0x4b   : > { %449 = vmatprep.subr.mxu0 %v213_v5  ;;  %p618_p10 = por %p617_p8, %p616_p6 }
  0x4c   : > { %450 = vmatpush3.msra.mxu0 %v213_v5 }
  0x4d   : > { %451 = vmatprep.subr.mxu0 %v212_v6  ;;  %p619_p0 = pnand %p618_p10, %p612_p4 }
  0x4e   : > { %452 = vmatpush3.msra.mxu0 %v212_v6 }
  0x4f   : > { %453 = vmatprep.subr.mxu0 %v211_v7 }
  0x50   : > { %454 = vmatpush3.msra.mxu0 %v211_v7 }
  0x51   : > { %455 = vmatprep.subr.mxu0 %v210_v8 }
  0x52   : > { %456 = vmatpush3.msra.mxu0 %v210_v8 }
  0x53   : > { %457 = vmatprep.subr.mxu0 %v209_v9 }
  0x54   : > { %458 = vmatpush3.msra.mxu0 %v209_v9 }
  0x55   : > { %459 = vmatprep.subr.mxu0 %v208_v10 }
  0x56   : > { %460 = vmatpush3.msra.mxu0 %v208_v10 }
  0x57   : > { %461 = vmatprep.subr.mxu0 %v207_v11 }
  0x58   : > { %462 = vmatpush3.msra.mxu0 %v207_v11 }
  0x59   : > { %463 = vmatprep.subr.mxu0 %v206_v12 }
  0x5a   : > { %464 = vmatpush3.msra.mxu0 %v206_v12 }
  0x5b   : > { %465 = vmatprep.subr.mxu0 %v205_v13 }
  0x5c   : > { %466 = vmatpush3.msra.mxu0 %v205_v13 }
  0x5d   : > { %467 = vmatprep.subr.mxu0 %v204_v14 }
  0x5e   : > { %468 = vmatpush3.msra.mxu0 %v204_v14 }
  0x5f   : > { %469 = vmatprep.subr.mxu0 %v203_v15 }
  0x60   : > { %470 = vmatpush3.msra.mxu0 %v203_v15 }
  0x61   : > { %471 = vmatprep.subr.mxu0 %v202_v16 }
  0x62   : > { %472 = vmatpush3.msra.mxu0 %v202_v16 }
  0x63   : > { %474 = vmatmul.mubr.f32.vlgmr.msra.gmra.mxu0 %v201_v17 }
 0x123   : > { %v475_v18 = vpop.f32.mrf.mxu0 }
 0x124   : > { %294 = vst [vmem:[%s197_s19 + $0x8] sm:$0xff] %v475_v18 }
 0x125   : > { %v284_v19 = vpop.f32.mrf.mxu0 }
 0x126   : > { %293 = vst [vmem:[%s197_s19] sm:$0xff] %v284_v19 }
 0x127   : > { %622 = shalt.err (!%p619_p0)
}
 0x128   : > { %s623_s4 = scalar_lea.hbm %s870_s23, 256  ;;  %s627_s5 = scalar_lea.hbm %s920_s2, 512 }
 0x129   : > { %p624_p1 = scmp.ne.s32.totalorder %s870_s23, %s623_s4  ;;  %p628_p9 = scmp.lt.s32.totalorder %s870_s23, %s920_s2 }
 0x12a   : > { %p629_p11 = scmp.lt.s32.totalorder %s627_s5, %s623_s4 }
 0x12b   : > { %p625_p5 = pnand %p624_p1, %p937_p12 }
 0x12c   : > { %p630_p2 = por %p629_p11, %p628_p9 }
 0x12d   : > { %p626_p7 = pneg %p625_p5 }
 0x12f   : > { %p631_p3 = pnand %p630_p2, %p626_p7 }
 0x131   : > { %634 = shalt.err (!%p631_p3)
}
 0x132   : > { %s701_s15 = smov 128   ;;  %s702_s17 = smov 256  }
 0x133   : > { %s703_s19 = smov 8  }
 0x134   : > { %482 = dma.vmem_to_hbm [thread:$0]  (%p937_p12), %s865_s22, 256, %s870_s23, %s296_s25, %s701_s15, %s702_s17, %s703_s19  }
 0x135 PF: > { %s938_s30 = sld [smem:[#allocation11_spill]]  ;;  %s326_s16 = sand.u32 1, %s673_s9  }
 0x136   : > { %p939_p13 = scmp.ne.s32.totalorder %s931_s21, 0  ;;  %s327_s18 = scalar_lea.sflag [#allocation4], %s326_s16 }
 0x13b   : > { %p940_p4 = scmp.ge.s32.totalorder %s938_s30, 2 }
 0x13d   : > { %p493_p6 = pnand %p940_p4, %p939_p13 }
 0x13f   : > { %p494_p8 = pneg %p493_p6 }
 0x141   : > { %668 = dma.done.wait (%p494_p8), %s327_s18, 256  }
 0x142   : > { %670 = vsyncadd (%p494_p8), %s327_s18, 4294967040  ;;  %s19_s28 = sadd.s32 1, %s938_s30   ;;  %s941_s9 = smov %s677_s10 }
 0x143   : > { %p16_p10 = scmp.ge.s32.totalorder %s19_s28, 4   ;;  %s942_s10 = smov %s681_s11 }
 0x144   : > { %s943_s11 = smov %s822_s14  ;;  %s944_s12 = smov %s689_s13 }
 0x145   : > { %s945_s13 = smov %s948_s27  ;;  %s946_s14 = smov %s19_s28 }
 0x146   :  { %18 = sbr.rel (!%p16_p10) target bundleno = 7 (0x7), region = 79 }
 0x14b   :  { %332 = vsyncpa [#allocation3], 1 }
 0x14c   :  { %334 = vsyncpa [#allocation3 + $0x1], 1 }
 0x14d   :  { %335 = vsyncpa [#allocation6], 1 }
 0x14e   :  { %337 = vsyncpa [#allocation6 + $0x1], 1 }
 0x14f   :  { %338 = vsyncpa [#allocation4], 1 }
 0x150   :  { %340 = vsyncpa [#allocation4 + $0x1], 1 }

</bundles_post_ra>
